<compile_context>
chip_gen: v5e
topology: v5e:2x2
jax: 0.10.0
libtpu: 0.0.40
codegen_flags: <defaults>
</compile_context>

<pallas_src>
import functools

import jax
import jax.numpy as jnp
from jax import lax
from jax.experimental import pallas as pl
from jax.experimental.pallas import tpu as pltpu

_TM = 128                        # M tile: keeps >=2 parallel blocks at small M (v7x 2nd core)
_TN = 256                        # N (lane) tile
_VMEM_LIMIT = 32 * 1024 * 1024   # fits v7x (64 MiB physical) with headroom


def _round_up(x, m):
    return ((x + m - 1) // m) * m


def _pad_n(n):
    return _round_up(n, _TN) if n >= _TN else _round_up(n, 128)


def _use_bf16_gate_math():
    """bf16 EUP/VPU exists on v6e/v7x; keep gate math in f32 elsewhere (v5e/older)."""
    try:
        kind = jax.devices()[0].device_kind.lower()
    except Exception:
        return False
    return ("v6" in kind) or ("v7" in kind)


# --------------------- Tiled matmul + bias (MXU kernel) -----------------------
def _matmul_bias_kernel(x_ref, w_ref, b_ref, o_ref):
    # x: (tm, Kp) bf16, w: (Kp, tn) bf16, b: (1, tn) f32 -> o: (tm, tn) o.dtype
    acc = jnp.dot(x_ref[...], w_ref[...], preferred_element_type=jnp.float32)
    o_ref[...] = (acc + b_ref[...]).astype(o_ref.dtype)


def matmul_bias(x, w_pad, b_pad, n_out, *, out_dtype=jnp.float32):
    """x: (M, K); w_pad: (Kp, Np) bf16 (pre-transposed/padded once);
    b_pad: (1, Np) f32.  Returns (M, n_out) in out_dtype (f32 accumulation).

    K stays resident (ninput/nhid are small here).
    TODO(synk): add K-tiling with an f32 accumulator before scaling nhid up.
    """
    M, K = x.shape
    Kp, Np = w_pad.shape

    if x.dtype != jnp.bfloat16:
        x = x.astype(jnp.bfloat16)
    if K != Kp:                                   # pad K only when unaligned
        x = jnp.zeros((M, Kp), jnp.bfloat16).at[:, :K].set(x)

    tm = min(_TM, _round_up(M, 8))
    Mp = _round_up(M, tm)
    if Mp != M:                                   # pad M only when unaligned
        x = jnp.zeros((Mp, Kp), jnp.bfloat16).at[:M, :].set(x)

    tn = min(_TN, Np)
    assert Np % tn == 0

    out = pl.pallas_call(
        _matmul_bias_kernel,
        out_shape=jax.ShapeDtypeStruct((Mp, Np), out_dtype),
        grid_spec=pltpu.PrefetchScalarGridSpec(
            num_scalar_prefetch=0,
            # N outer: the (Kp, tn) weight stripe keeps the same block index
            # across the inner M sweep, so it is streamed from HBM only once.
            grid=(Np // tn, Mp // tm),
            in_specs=[pl.BlockSpec((tm, Kp), lambda j, i: (i, 0)),
                      pl.BlockSpec((Kp, tn), lambda j, i: (0, j)),
                      pl.BlockSpec((1, tn), lambda j, i: (0, j))],
            out_specs=pl.BlockSpec((tm, tn), lambda j, i: (i, j))),
        compiler_params=pltpu.CompilerParams(
            dimension_semantics=("parallel", "parallel"),
            vmem_limit_bytes=_VMEM_LIMIT),
    )(x, w_pad, b_pad)

    if Mp != M or Np != n_out:
        out = out[:M, :n_out]
    return out


# --------------------- LSTM recurrence (h @ W_hh only) ------------------------
def _lstm_recurrent_kernel(gx_ref, whh_ref, y_ref, hn_ref, cn_ref,
                           h_sc, c_sc, *, nhid, t_blk, bf16_gates):
    """One grid step == t_blk time steps.  h/c carried in f32 VMEM scratch."""
    H = nhid

    @pl.when(pl.program_id(0) == 0)
    def _():
        # PyTorch forward calls self.rnn(embeddings) with no hidden -> zeros.
        h_sc[...] = jnp.zeros_like(h_sc)
        c_sc[...] = jnp.zeros_like(c_sc)

    def sigmoid(x):
        # sigmoid(x) = recip(1 + exp(-x)); approx reciprocal lands in the EUP slot.
        return pl.reciprocal(1.0 + jnp.exp(-x).astype(jnp.float32), approx=True)

    def step(t, carry):
        # gx already holds x @ W_ih^T + (b_ih + b_hh), hoisted out of the recurrence.
        gates = gx_ref[t].astype(jnp.float32) + jnp.dot(
            h_sc[...].astype(jnp.bfloat16), whh_ref[...],
            preferred_element_type=jnp.float32)                # (B, 4H) f32
        # bf16 transcendental chain on v6e/v7x (bf16 EUP/VPU); f32 on v5e.
        g_in = gates.astype(jnp.bfloat16) if bf16_gates else gates

        i = sigmoid(g_in[:, 0 * H:1 * H])                      # H is lane-aligned -> cheap slices
        f = sigmoid(g_in[:, 1 * H:2 * H])
        g = jnp.tanh(g_in[:, 2 * H:3 * H]).astype(jnp.float32)
        o = sigmoid(g_in[:, 3 * H:4 * H])

        c = f * c_sc[...] + i * g                              # f32 state accumulation
        h = o * jnp.tanh(c)

        h_sc[...] = h
        c_sc[...] = c
        y_ref[t] = h.astype(y_ref.dtype)                       # bf16 writeback (half HBM)
        return carry

    # Partial unroll keeps LLO scheduling visibility without blowing up code size.
    lax.fori_loop(0, t_blk, step, 0, unroll=min(4, t_blk))

    @pl.when(pl.program_id(0) == pl.num_programs(0) - 1)
    def _():
        hn_ref[...] = h_sc[...]
        cn_ref[...] = c_sc[...]


def _pick_t_blk(S, B, H, budget=6 * 1024 * 1024):
    """Largest divisor of S whose double-buffered blocks fit a small VMEM budget
    (whole sequence when possible -> a single grid step, no pipeline overhead)."""
    best = 1
    for t in range(1, S + 1):
        if S % t:
            continue
        blk = 2 * (t * B * 4 * H * 2 + t * B * H * 2)   # gx + y blocks, x2 buffers, bf16
        blk += 2 * H * 4 * H * 2                        # resident W_hh (x2 buffers)
        blk += 4 * B * H * 4                            # h/c scratch + hn/cn
        if blk <= budget:
            best = t
    return best


def lstm_recurrent(gates_x, w_hh_t, *, bf16_gates):
    """gates_x: (S,B,4H) bf16, w_hh_t: (H,4H) bf16
       -> y (S,B,H) bf16, h_n (B,H) f32, c_n (B,H) f32."""
    S, B, H4 = gates_x.shape
    H = H4 // 4
    t_blk = _pick_t_blk(S, B, H)
    # TODO(synk): on v7x with B >= 16, add a leading "parallel" batch axis to
    # split the recurrence across the two TensorCores.

    kernel = functools.partial(_lstm_recurrent_kernel, nhid=H, t_blk=t_blk,
                               bf16_gates=bf16_gates)
    y, hn, cn = pl.pallas_call(
        kernel,
        out_shape=(jax.ShapeDtypeStruct((S, B, H), jnp.bfloat16),
                   jax.ShapeDtypeStruct((B, H), jnp.float32),
                   jax.ShapeDtypeStruct((B, H), jnp.float32)),
        grid_spec=pltpu.PrefetchScalarGridSpec(
            num_scalar_prefetch=0,
            grid=(S // t_blk,),
            in_specs=[pl.BlockSpec((t_blk, B, H4), lambda s: (s, 0, 0)),
                      pl.BlockSpec((H, H4), lambda s: (0, 0))],   # resident weight
            out_specs=[pl.BlockSpec((t_blk, B, H), lambda s: (s, 0, 0)),
                       pl.BlockSpec((B, H), lambda s: (0, 0)),
                       pl.BlockSpec((B, H), lambda s: (0, 0))],
            scratch_shapes=[pltpu.VMEM((B, H), jnp.float32),
                            pltpu.VMEM((B, H), jnp.float32)]),
        compiler_params=pltpu.CompilerParams(
            dimension_semantics=("arbitrary",),   # serial recurrence
            vmem_limit_bytes=_VMEM_LIMIT),
    )(gates_x, w_hh_t)
    return y, hn, cn


# ------------------------------- Parameters -----------------------------------
def init_lm_params(key, nvoc, ninput, nhid, nlayers):
    init_uniform = 0.1
    stdv = 1.0 / jnp.sqrt(nhid)
    keys = jax.random.split(key, 2 + 4 * nlayers)
    params = {
        "encoder_w": jax.random.uniform(keys[0], (nvoc, ninput),
                                        minval=-init_uniform, maxval=init_uniform,
                                        dtype=jnp.float32),
        "decoder_w": jax.random.uniform(keys[1], (nvoc, nhid),
                                        minval=-init_uniform, maxval=init_uniform,
                                        dtype=jnp.float32),
        "decoder_b": jnp.zeros((nvoc,), jnp.float32),
        "lstm": [],
    }
    for l in range(nlayers):
        in_dim = ninput if l == 0 else nhid
        k = keys[2 + 4 * l: 2 + 4 * (l + 1)]
        params["lstm"].append({
            "w_ih": jax.random.uniform(k[0], (4 * nhid, in_dim),
                                       minval=-stdv, maxval=stdv, dtype=jnp.float32),
            "w_hh": jax.random.uniform(k[1], (4 * nhid, nhid),
                                       minval=-stdv, maxval=stdv, dtype=jnp.float32),
            "b_ih": jax.random.uniform(k[2], (4 * nhid,),
                                       minval=-stdv, maxval=stdv, dtype=jnp.float32),
            "b_hh": jax.random.uniform(k[3], (4 * nhid,),
                                       minval=-stdv, maxval=stdv, dtype=jnp.float32),
        })
    return params


def prepare_params(params):
    """ONE-TIME weight prep: transpose, cast to bf16, pad to tile-aligned shapes.
    Do this once (outside the step) so the forward pass does no weight plumbing."""
    def prep_w(w_t):
        K, N = w_t.shape
        Kp, Np = _round_up(K, 128), _pad_n(N)
        w = w_t.astype(jnp.bfloat16)
        if (Kp, Np) != (K, N):
            w = jnp.zeros((Kp, Np), jnp.bfloat16).at[:K, :N].set(w)
        return w

    def prep_b(b):
        Np = _pad_n(b.shape[0])
        return jnp.zeros((1, Np), jnp.float32).at[0, :b.shape[0]].set(
            b.astype(jnp.float32))

    nvoc = params["decoder_w"].shape[0]
    prepped = {
        # bf16 embedding table: the gather directly yields bf16 matmul operands.
        "encoder_w": params["encoder_w"].astype(jnp.bfloat16),
        "decoder_w_t": prep_w(params["decoder_w"].T),            # (H, Vp) bf16
        "decoder_b": prep_b(params["decoder_b"]),                # (1, Vp) f32
        "nvoc": nvoc,
        "lstm": [],
    }
    for layer in params["lstm"]:
        prepped["lstm"].append({
            "w_ih_t": prep_w(layer["w_ih"].T),                   # (Ip, 4H) bf16
            "w_hh_t": layer["w_hh"].T.astype(jnp.bfloat16),      # (H, 4H) bf16
            "bias": prep_b(layer["b_ih"] + layer["b_hh"]),       # fused LSTM bias
            "gate_dim": int(layer["w_ih"].shape[0]),
        })
    return prepped


# ------------------------------- Full model -----------------------------------
def lm_model_forward(prepped, tokens):
    """tokens: (seq_len, batch) int32 -> (decoded (S,B,nvoc) f32, (h_n, c_n) f32)."""
    S, B = tokens.shape
    bf16_gates = _use_bf16_gate_math()

    # Embedding lookup (gather) kept as JAX glue; table already bf16.
    x = jnp.take(prepped["encoder_w"], tokens, axis=0)           # (S, B, I) bf16
    # TODO(synk): nn.Dropout(0.5) is stochastic; modeled as identity (eval mode).

    h_list, c_list = [], []
    for layer in prepped["lstm"]:
        H4 = layer["gate_dim"]
        # Hoisted input projection: one big MXU matmul over all S*B rows,
        # emitted in bf16 to halve the HBM stream feeding the recurrence.
        gates_x = matmul_bias(x.reshape(S * B, x.shape[-1]),
                              layer["w_ih_t"], layer["bias"], H4,
                              out_dtype=jnp.bfloat16).reshape(S, B, H4)
        # Serial recurrence: only h @ W_hh^T per time step; y comes back bf16.
        x, hn, cn = lstm_recurrent(gates_x, layer["w_hh_t"], bf16_gates=bf16_gates)
        h_list.append(hn)
        c_list.append(cn)

    h_n = jnp.stack(h_list, axis=0)                              # (nlayers, B, nhid) f32
    c_n = jnp.stack(c_list, axis=0)

    decoded = matmul_bias(x.reshape(S * B, x.shape[-1]),
                          prepped["decoder_w_t"], prepped["decoder_b"],
                          prepped["nvoc"], out_dtype=jnp.float32)
    return decoded.reshape(S, B, prepped["nvoc"]), (h_n, c_n)


if __name__ == "__main__":
    # Lane/sublane-aligned small shapes: B multiple of 8, nhid multiple of 128.
    nvoc, ninput, nhid, nlayers = 512, 128, 128, 2
    seq_len, batch = 32, 8

    key = jax.random.PRNGKey(0)
    pkey, tkey = jax.random.split(key)
    params = init_lm_params(pkey, nvoc, ninput, nhid, nlayers)
    prepped = prepare_params(params)      # one-time transpose/cast/pad of weights
    tokens = jax.random.randint(tkey, (seq_len, batch), 0, nvoc, dtype=jnp.int32)

    decoded, (h_n, c_n) = lm_model_forward(prepped, tokens)
    jax.block_until_ready((decoded, h_n, c_n))

    assert decoded.shape == (seq_len, batch, nvoc)
    assert h_n.shape == (nlayers, batch, nhid)
    assert c_n.shape == (nlayers, batch, nhid)
    assert bool(jnp.all(jnp.isfinite(decoded)))
    assert bool(jnp.all(jnp.isfinite(h_n))) and bool(jnp.all(jnp.isfinite(c_n)))
    print("KERNEL_OK")
</pallas_src>

<mosaic_0001>
module attributes {stable_mosaic.version = 11 : i64} {
  func.func @_matmul_bias_kernel(%arg0: i32, %arg1: i32, %arg2: memref<128x128xbf16, #tpu.memory_space<vmem>>, %arg3: memref<128x256xbf16, #tpu.memory_space<vmem>>, %arg4: memref<1x256xf32, #tpu.memory_space<vmem>>, %arg5: memref<128x256xbf16, #tpu.memory_space<vmem>>) attributes {dimension_semantics = [#tpu.dimension_semantics<parallel>, #tpu.dimension_semantics<parallel>], iteration_bounds = array<i64: 2, 2>, scalar_prefetch = 0 : i64, scratch_operands = 0 : i64, tpu.core_type = #tpu.core_type<tc>, window_params = [{transform_indices = @transform_0, window_bounds = array<i64: 128, 128>}, {transform_indices = @transform_1, window_bounds = array<i64: 128, 256>}, {transform_indices = @transform_2, window_bounds = array<i64: 1, 256>}, {transform_indices = @transform_3, window_bounds = array<i64: 128, 256>}]} {
    %c0 = arith.constant 0 : index
    %c0_0 = arith.constant 0 : index
    %0 = vector.load %arg2[%c0, %c0_0] : memref<128x128xbf16, #tpu.memory_space<vmem>>, vector<128x128xbf16>
    %c0_1 = arith.constant 0 : index
    %c0_2 = arith.constant 0 : index
    %1 = vector.load %arg3[%c0_1, %c0_2] : memref<128x256xbf16, #tpu.memory_space<vmem>>, vector<128x256xbf16>
    %cst = arith.constant dense<0.000000e+00> : vector<128x256xf32>
    %2 = tpu.matmul %0, %1, %cst {dimension_numbers = #tpu.dot_dimension_numbers<[1], [0], [0], [1], [0, 0, 1, 1], [], []>} : vector<128x128xbf16>, vector<128x256xbf16>, vector<128x256xf32> -> vector<128x256xf32>
    %c0_3 = arith.constant 0 : index
    %c0_4 = arith.constant 0 : index
    %3 = vector.load %arg4[%c0_3, %c0_4] : memref<1x256xf32, #tpu.memory_space<vmem>>, vector<1x256xf32>
    %4 = vector.broadcast %3 : vector<1x256xf32> to vector<128x256xf32>
    %5 = arith.addf %2, %4 : vector<128x256xf32>
    %6 = arith.truncf %5 : vector<128x256xf32> to vector<128x256xbf16>
    %c0_5 = arith.constant 0 : index
    %c0_6 = arith.constant 0 : index
    %7 = vector.load %arg5[%c0_5, %c0_6] : memref<128x256xbf16, #tpu.memory_space<vmem>>, vector<128x256xbf16>
    tpu.vector_store %arg5[%c0_5, %c0_6], %6 {strides = array<i32>} : memref<128x256xbf16, #tpu.memory_space<vmem>>, vector<128x256xbf16>,
    return
  }
  func.func @transform_0(%arg0: i32, %arg1: i32) -> (i32, i32) {
    %c0_i32 = arith.constant 0 : i32
    %c0_i32_0 = arith.constant 0 : i32
    return %arg1, %c0_i32 : i32, i32
  }
  func.func @transform_1(%arg0: i32, %arg1: i32) -> (i32, i32) {
    %c0_i32 = arith.constant 0 : i32
    %c0_i32_0 = arith.constant 0 : i32
    return %c0_i32, %arg0 : i32, i32
  }
  func.func @transform_2(%arg0: i32, %arg1: i32) -> (i32, i32) {
    %c0_i32 = arith.constant 0 : i32
    %c0_i32_0 = arith.constant 0 : i32
    return %c0_i32, %arg0 : i32, i32
  }
  func.func @transform_3(%arg0: i32, %arg1: i32) -> (i32, i32) {
    %c0_i32 = arith.constant 0 : i32
    return %arg1, %arg0 : i32, i32
  }
}

</mosaic_0001>

<bundles_post_ra>
// kernel: tpu_custom_call.1
= control target key start
LH: loop header
LB: loop body
LE: loop exit
PB: predicated region body
PF: predicated region fallthrough
CT: control target
= control target key end

     0   :  { %s1683_s0 = inlined_call_operand.hbm [shape: bf16[256,128], index: 0, kind: input, shape index: {}]   ;;  %s1684_s1 = inlined_call_operand.hbm [shape: bf16[128,512], index: 1, kind: input, shape index: {}]   ;;  %s1685_s2 = inlined_call_operand.hbm [shape: f32[1,512], index: 2, kind: input, shape index: {}]   ;;  %s1686_s3 = inlined_call_operand.hbm [shape: bf16[256,512], index: 3, kind: output, shape index: {}]  }
   0x1   :  { %1699 = sst [smem:[#allocation25_spill]] %s1684_s1 }
   0x2   :  { %1700 = sst [smem:[#allocation26_spill]] %s1686_s3 }
   0x3   :  { %8 = vsyncpa [#allocation3], 0 }
   0x4   :  { %10 = vsyncpa [#allocation3 + $0x1], 0 }
   0x5   :  { %11 = vsyncpa [#allocation6], 0 }
   0x6   :  { %13 = vsyncpa [#allocation6 + $0x1], 0 }
   0x7   :  { %14 = vsyncpa [#allocation4], 0 }
   0x8   :  { %16 = vsyncpa [#allocation4 + $0x1], 0  ;;  %s1310_s12 = smov 0   ;;  %s1312_s13 = smov 0  }
   0x9   :  { %s1314_s14 = smov 0   ;;  %s1316_s15 = smov 0  }
   0xa   :  { %s1318_s16 = smov 0   ;;  %s1320_s17 = smov 0  }
   0xb   :  { %s1322_s18 = smov 0   ;;  %s1324_s19 = smov 0  }
   0xc   :  { %s1326_s20 = smov 0   ;;  %s1328_s21 = smov 0  }
   0xd   :  { %s1330_s22 = smov 0   ;;  %s1332_s23 = smov 0  }
   0xe   :  { %s1334_s24 = smov 0   ;;  %s1336_s25 = smov 0  }
   0xf LB: > { %1701 = sst [smem:[#allocation12_spill]] %s1228_s12  ;;  %p49_p0 = scmp.eq.s32.totalorder %s1280_s25, 0  ;;  %s1280_s25 = sphi %s1336_s25, %s22_s25   ;;  %s1276_s24 = sphi %s1334_s24, %s1749_s24   ;;  %s1272_s23 = sphi %s1332_s23, %s1738_s23   ;;  %s1268_s22 = sphi %s1330_s22, %s1748_s22   ;;  %s1264_s21 = sphi %s1328_s21, %s1747_s21   ;;  %s1260_s20 = sphi %s1326_s20, %s1736_s20   ;;  %s1256_s19 = sphi %s1324_s19, %s1746_s19   ;;  %s1252_s18 = sphi %s1322_s18, %s1745_s18   ;;  %s1248_s17 = sphi %s1320_s17, %s1744_s17   ;;  %s1244_s16 = sphi %s1318_s16, %s1743_s16   ;;  %s1240_s15 = sphi %s1316_s15, %s1742_s15   ;;  %s1236_s14 = sphi %s1314_s14, %s1733_s14   ;;  %s1232_s13 = sphi %s1312_s13, %s1741_s13   ;;  %s1228_s12 = sphi %s1310_s12, %s1740_s12  }
  0x10   : > { %1702 = sst [smem:[#allocation13_spill]] %s1236_s14  ;;  %p74_p1 = scmp.ne.s32.totalorder %s1248_s17, %s1244_s16 }
  0x11   : > { %1703 = sst [smem:[#allocation14_spill]] %s1260_s20  ;;  %p80_p2 = scmp.ne.s32.totalorder %s1244_s16, %s1240_s15 }
  0x12   : > { %1704 = sst [smem:[#allocation15_spill]] %s1264_s21  ;;  %p1690_p3 = scmp.lt.s32.totalorder %s1280_s25, 4 }
  0x13   : > { %1705 = sst [smem:[#allocation16_spill]] %s1268_s22  ;;  %p76_p4 = por %p74_p1, %p49_p0 }
  0x14   : > { %1706 = sst [smem:[#allocation17_spill]] %s1272_s23  ;;  %s180_s27 = sand.u32 1, %s1280_s25  }
  0x15   : > { %s1687_s28 = sand.u32 1, %s1248_s17   ;;  %s854_s30 = sshll.u32 %s1276_s24, 3 }
  0x16   : > { %s740_s29 = sshll.u32 %s1687_s28, 7  ;;  %s1707_s1 = sld [smem:[#allocation25_spill]] }
  0x17   : > { %s184_s8 = scalar_lea.vmem [#allocation5], %s740_s29  ;;  %p1399_p5 = pnand %p1690_p3, %p76_p4 }
  0x18   : > { %s192_s9 = sshll.u32 %s184_s8, 4  ;;  %p745_p6 = scmp.ge.s32.totalorder %s1280_s25, 1  ;;  %s193_s9 = int_to_ptr.vmem [resolvable:$true] %s192_s9 }
  0x19   : > { %s1404_s11 = scalar_lea.sflag [#allocation6], %s180_s27  ;;  %s1282_s29 = smov 256  }
  0x1a   : > { %s1284_s4 = smov 8   ;;  %p219_p7 = scmp.lt.s32.totalorder %s1280_s25, 5 }
  0x1b   : > { %s734_s27 = sadd.s32 4294967294, %s1280_s25   ;;  %s31_s8 = sadd.s32 1, %s1272_s23 }
  0x1c   : > { %s189_s6 = scalar_lea.hbm %s1707_s1, %s854_s30  ;;  %s1283_s30 = smov 128  }
  0x1d   : > { %s190_s7 = sshll.u32 %s189_s6, 4  ;;  %p1410_p8 = pnand %p745_p6, %p219_p7  ;;  %s191_s7 = int_to_ptr.hbm [resolvable:$true] %s190_s7 }
  0x1e   : > { %910 = dma.hbm_to_vmem [thread:$0]  (!%p1399_p5), %s191_s7, 2048, %s193_s9, %s1404_s11, %s1282_s29, %s1283_s30, %s1284_s4  }
  0x1f   : > { %s1415_s6 = sadd.s32 4294967295, %s1280_s25   ;;  %s34_s28 = sadd.s32 1, %s1276_s24 }
  0x20   : > { %p32_p9 = scmp.ge.s32.totalorder %s31_s8, 2  ;;  %s41_s26 = sadd.s32 1, %s1260_s20 }
  0x21   : > { %p48_p10 = scmp.ne.s32.totalorder %s1260_s20, %s1256_s19  ;;  %p54_p11 = scmp.ne.s32.totalorder %s1256_s19, %s1252_s18 }
  0x22   : > { %s1751_s8 = smov (%p32_p9, %s31_s8), 0  ;;  %s1753_s28 = smov (!%p32_p9, %s34_s28), %s1276_s24 }
  0x23   : > { %1710 = sst [smem:[#allocation18_spill]] %s1751_s8  ;;  %s38_s7 = ssub.s32 %s1272_s23, %s1751_s8 }
  0x24   : > { %p1432_p12 = por %p49_p0, %p48_p10  ;;  %p36_p13 = scmp.ge.s32.totalorder %s1753_s28, 2 }
  0x25   : > { %p39_p1 = scmp.eq.s32.totalorder %s38_s7, 0  ;;  %p55_p4 = scmp.eq.s32.totalorder %s1415_s6, 0 }
  0x26   : > { %s121_s18 = sadd.s32 1, %s1236_s14  ;;  %s1755_s28 = smov (%p36_p13, %s1753_s28), 0 }
  0x27   : > { %1712 = sst [smem:[#allocation19_spill]] %s1755_s28  ;;  %p1443_p6 = por %p55_p4, %p54_p11 }
  0x28   : > { %s1441_s29 = scalar_select %p39_p1, %s1260_s20, %s41_s26  }
  0x29   : > { %s64_s4 = ssub.s32 %s1276_s24, %s1755_s28  ;;  %p1452_p7 = por %p80_p2, %p55_p4 }
  0x2a   : > { %1713 = sst [smem:[#allocation20_spill]] %s1441_s29  ;;  %p65_p0 = scmp.eq.s32.totalorder %s64_s4, 0 }
  0x2b   : > { %s118_s8 = sor.u32 %s64_s4, %s38_s7  ;;  %p131_p9 = scmp.ne.s32.totalorder %s1236_s14, %s1232_s13 }
  0x2c   : > { %s1716_s3 = sadd.s32 1, %s1248_s17  ;;  %p119_p10 = scmp.eq.s32.totalorder %s118_s8, 0 }
  0x2d   : > { %s1461_s21 = scalar_select %p65_p0, %s1248_s17, %s1716_s3  }
  0x2e   : > { %p132_p13 = scmp.eq.s32.totalorder %s1415_s6, 3  ;;  %p137_p11 = scmp.ne.s32.totalorder %s1232_s13, %s1228_s12 }
  0x2f   : > { %1717 = sst [smem:[#allocation21_spill]] %s1461_s21  ;;  %p138_p1 = scmp.eq.s32.totalorder %s734_s27, 3 }
  0x30   : > { %s1467_s26 = scalar_select %p119_p10, %s1236_s14, %s121_s18  }
  0x31   : > { %p1469_p3 = por %p132_p13, %p131_p9  ;;  %p1473_p2 = por %p138_p1, %p137_p11 }
  0x32   : > { %1718 = sst [smem:[#allocation22_spill]] %s1467_s26  ;;  %s158_s3 = sand.u32 1, %s1260_s20  }
  0x33   : > { %s1719_s15 = scalar_select %p1469_p3, 1, 0 }
  0x34   : > { %s1721_s28 = scalar_select %p1473_p2, 1, 0 }
  0x35   : > { %1720 = sst [smem:[#allocation23_spill]] %s1719_s15  ;;  %s853_s7 = sshll.u32 %s1272_s23, 6 }
  0x36   : > { %1722 = sst [smem:[#allocation24_spill]] %s1721_s28  ;;  %s737_s8 = sshll.u32 %s158_s3, 6 }
  0x37   : > { %s167_s21 = scalar_lea.hbm %s1683_s0, %s853_s7  ;;  %s162_s27 = scalar_lea.vmem [#allocation2], %s737_s8 }
  0x38   : > { %s168_s12 = sshll.u32 %s167_s21, 4  ;;  %s170_s18 = sshll.u32 %s162_s27, 4  ;;  %s169_s12 = int_to_ptr.hbm [resolvable:$true] %s168_s12  ;;  %s171_s18 = int_to_ptr.vmem [resolvable:$true] %s170_s18 }
  0x39   : > { %p1723_p4 = scmp.lt.s32.totalorder %s1280_s25, 4  ;;  %s1724_s26 = sand.u32 1, %s1248_s17  }
  0x3a   : > { %s743_s14 = sshll.u32 %s1724_s26, 1  ;;  %s159_s28 = scalar_lea.sflag [#allocation3], %s158_s3 }
  0x3b   : > { %p905_p0 = pnand %p1723_p4, %p1432_p12  ;;  %s1285_s20 = smov 64  }
  0x3c   : > { %s1286_s23 = smov 4   ;;  %s744_s15 = sshll.u32 %s1276_s24, 1 }
  0x3d   : > { %907 = dma.hbm_to_vmem [thread:$0]  (!%p905_p0), %s169_s12, 1024, %s171_s18, %s159_s28, %s1285_s20, %s1285_s20, %s1286_s23  }
  0x3e   : > { %s206_s22 = scalar_lea.vmem [#allocation7], %s743_s14  ;;  %s210_s8 = scalar_lea.hbm %s1685_s2, %s744_s15 }
  0x3f   : > { %s214_s29 = sshll.u32 %s206_s22, 4  ;;  %s212_s4 = sshll.u32 %s210_s8, 4  ;;  %s215_s29 = int_to_ptr.vmem [resolvable:$true] %s214_s29  ;;  %s213_s4 = int_to_ptr.hbm [resolvable:$true] %s212_s4 }
  0x40   : > { %913 = dma.hbm_to_vmem [thread:$0]  (!%p1399_p5), %s213_s4, 32, %s215_s29, %s1404_s11  }
  0x41   : > { %223 = sbr.rel (%p1410_p8) target bundleno = 307 (0x133), region = 32  ;;  %s225_s9 = sand.u32 (!%p1410_p8), 1, %s1256_s19  }
  0x42   : > { %s746_s26 = sshll.u32 (!%p1410_p8), %s225_s9, 6  ;;  %s226_s12 = scalar_lea.sflag (!%p1410_p8), [#allocation3], %s225_s9 }
  0x43   : > { %s1498_s20 = scalar_lea.vmem (!%p1410_p8), [#allocation2], %s746_s26 }
  0x46   : > { %1215 = dma.done.wait (%p1443_p6), %s226_s12, 1024  }
  0x47   : > { %1217 = vsyncadd (%p1443_p6), %s226_s12, 4294966272  ;;  %s235_s14 = sand.u32 1, %s1415_s6   ;;  %s237_s22 = sand.u32 1, %s1244_s16  }
  0x48   : > { %s747_s23 = sshll.u32 %s237_s22, 7  ;;  %s236_s28 = scalar_lea.sflag [#allocation6], %s235_s14 }
  0x49   : > { %s1508_s10 = scalar_lea.vmem [#allocation5], %s747_s23 }
  0x4a   : > { %1219 = dma.done.wait (%p1452_p7), %s236_s28, 2080  }
  0x4b   : > { %1221 = vsyncadd (%p1452_p7), %s236_s28, 4294965216  ;;  %v840_v0 = vld [vmem:[%s1508_s10 + $0x70] sm:$0xf]  ;;  %v878_v1 = vld [vmem:[%s1508_s10 + $0x74] sm:$0xf0]  ;;  %s748_s1 = sshll.u32 %s237_s22, 1 }
  0x4c   : > { %v877_v2 = vld [vmem:[%s1508_s10 + $0x74] sm:$0xf]  ;;  %v841_v3 = vor.u32 %v878_v1, %v840_v0  ;;  %v842_v4 = vld [vmem:[%s1508_s10 + $0x78] sm:$0xf0]  ;;  %v832_v5 = vld [vmem:[%s1508_s10 + $0x60] sm:$0xf] }
  0x4d   : > { %v876_v6 = vld [vmem:[%s1508_s10 + $0x64] sm:$0xf0]  ;;  %v845_v7 = vor.u32 %v877_v2, %v842_v4  ;;  %v875_v8 = vld [vmem:[%s1508_s10 + $0x64] sm:$0xf]  ;;  %v834_v9 = vld [vmem:[%s1508_s10 + $0x68] sm:$0xf0] }
  0x4e   : > { %454 = vmatpush.bf16.msra.mxu0 %v841_v3  ;;  %880 = vmatpush.bf16.msra.mxu2 %v841_v3  ;;  %v833_v10 = vor.u32 %v876_v6, %v832_v5  ;;  %v837_v11 = vor.u32 %v875_v8, %v834_v9  ;;  %v824_v12 = vld [vmem:[%s1508_s10 + $0x50] sm:$0xf]  ;;  %v874_v13 = vld [vmem:[%s1508_s10 + $0x54] sm:$0xf0]  ;;  %v873_v14 = vld [vmem:[%s1508_s10 + $0x54] sm:$0xf] }
  0x4f   : > { %503 = vmatpush.bf16.msra.mxu1 %v845_v7  ;;  %888 = vmatpush.bf16.msra.mxu3 %v845_v7  ;;  %v826_v15 = vld [vmem:[%s1508_s10 + $0x58] sm:$0xf0]  ;;  %v825_v16 = vor.u32 %v874_v13, %v824_v12  ;;  %v816_v18 = vld [vmem:[%s1508_s10 + $0x40] sm:$0xf]  ;;  %v872_v19 = vld [vmem:[%s1508_s10 + $0x44] sm:$0xf0] }
  0x50   : > { %v829_v17 = vor.u32 %v873_v14, %v826_v15  ;;  %v871_v20 = vld [vmem:[%s1508_s10 + $0x44] sm:$0xf]  ;;  %v818_v21 = vld [vmem:[%s1508_s10 + $0x48] sm:$0xf0]  ;;  %v817_v22 = vor.u32 %v872_v19, %v816_v18  ;;  %v808_v24 = vld [vmem:[%s1508_s10 + $0x30] sm:$0xf] }
  0x51   : > { %v821_v23 = vor.u32 %v871_v20, %v818_v21  ;;  %v870_v25 = vld [vmem:[%s1508_s10 + $0x34] sm:$0xf0]  ;;  %v869_v26 = vld [vmem:[%s1508_s10 + $0x34] sm:$0xf]  ;;  %v810_v27 = vld [vmem:[%s1508_s10 + $0x38] sm:$0xf0] }
  0x52   : > { %455 = vmatpush.bf16.msra.mxu0 %v833_v10  ;;  %881 = vmatpush.bf16.msra.mxu2 %v833_v10  ;;  %v809_v28 = vor.u32 %v870_v25, %v808_v24  ;;  %v813_v29 = vor.u32 %v869_v26, %v810_v27  ;;  %v800_v30 = vld [vmem:[%s1508_s10 + $0x20] sm:$0xf]  ;;  %v868_v31 = vld [vmem:[%s1508_s10 + $0x24] sm:$0xf0]  ;;  %v867_v32 = vld [vmem:[%s1508_s10 + $0x24] sm:$0xf] }
  0x53   : > { %504 = vmatpush.bf16.msra.mxu1 %v837_v11  ;;  %889 = vmatpush.bf16.msra.mxu3 %v837_v11  ;;  %v802_v33 = vld [vmem:[%s1508_s10 + $0x28] sm:$0xf0]  ;;  %v801_v34 = vor.u32 %v868_v31, %v800_v30  ;;  %v792_v36 = vld [vmem:[%s1508_s10 + $0x10] sm:$0xf]  ;;  %v866_v37 = vld [vmem:[%s1508_s10 + $0x14] sm:$0xf0] }
  0x54   : > { %v805_v35 = vor.u32 %v867_v32, %v802_v33  ;;  %v865_v38 = vld [vmem:[%s1508_s10 + $0x14] sm:$0xf]  ;;  %v794_v39 = vld [vmem:[%s1508_s10 + $0x18] sm:$0xf0]  ;;  %v793_v40 = vor.u32 %v866_v37, %v792_v36  ;;  %v784_v42 = vld [vmem:[%s1508_s10] sm:$0xf] }
  0x55   : > { %v797_v41 = vor.u32 %v865_v38, %v794_v39  ;;  %v864_v43 = vld [vmem:[%s1508_s10 + $0x4] sm:$0xf0]  ;;  %v863_v44 = vld [vmem:[%s1508_s10 + $0x4] sm:$0xf]  ;;  %v786_v45 = vld [vmem:[%s1508_s10 + $0x8] sm:$0xf0] }
  0x56   : > { %456 = vmatpush.bf16.msra.mxu0 %v825_v16  ;;  %882 = vmatpush.bf16.msra.mxu2 %v825_v16  ;;  %v785_v46 = vor.u32 %v864_v43, %v784_v42  ;;  %v789_v47 = vor.u32 %v863_v44, %v786_v45  ;;  %v855_v48 = vld [vmem:[%s1498_s20] sm:$0xff]  ;;  %v856_v50 = vld [vmem:[%s1498_s20 + $0x8] sm:$0xff]  ;;  %v857_v52 = vld [vmem:[%s1498_s20 + $0x10] sm:$0xff]  ;;  %s249_s11 = scalar_lea.vmem [#allocation7], %s748_s1  ;;  %s280_s5 = sand.u32 1, %s1232_s13  }
  0x57   : > { %505 = vmatpush.bf16.msra.mxu1 %v829_v17  ;;  %890 = vmatpush.bf16.msra.mxu3 %v829_v17  ;;  %v859_v49 = vld [vmem:[%s1498_s20 + $0x20] sm:$0xff]  ;;  %v860_v51 = vld [vmem:[%s1498_s20 + $0x28] sm:$0xff]  ;;  %v861_v53 = vld [vmem:[%s1498_s20 + $0x30] sm:$0xff]  ;;  %s749_s6 = sshll.u32 %s280_s5, 7  ;;  %s1725_s15 = sld [smem:[#allocation16_spill]] }
  0x58   : > { %v858_v54 = vld [vmem:[%s1498_s20 + $0x18] sm:$0xff]  ;;  %v320_v56 = vld [vmem:[%s249_s11] sm:$0x3]  ;;  %s1565_s30 = scalar_lea.vmem [#allocation8], %s749_s6  ;;  %s1726_s3 = sld [smem:[#allocation15_spill]] }
  0x59   : > { %v862_v55 = vld [vmem:[%s1498_s20 + $0x38] sm:$0xff]  ;;  %v1556_v57 = vperm.slane %v320_v56, 0  ;;  %v1559_v58 = vperm.slane %v320_v56, 1  ;;  %s1727_s4 = sld [smem:[#allocation26_spill]]  ;;  %s600_s26 = sshll.u32 %s1565_s30, 4  ;;  %s601_s26 = int_to_ptr.vmem [resolvable:$true] %s600_s26 }
  0x5a   : > { %457 = vmatpush.bf16.msra.mxu0 %v817_v22  ;;  %883 = vmatpush.bf16.msra.mxu2 %v817_v22  ;;  %s585_s14 = scalar_lea.sflag [#allocation4], %s280_s5 }
  0x5b   : > { %506 = vmatpush.bf16.msra.mxu1 %v821_v23  ;;  %891 = vmatpush.bf16.msra.mxu3 %v821_v23 }
  0x5d   : > { %s848_s27 = sshll.u32 %s1725_s15, 1 }
  0x5e   : > { %458 = vmatpush.bf16.msra.mxu0 %v809_v28  ;;  %884 = vmatpush.bf16.msra.mxu2 %v809_v28  ;;  %s879_s18 = sshll.u32 %s1726_s3, 6 }
  0x5f   : > { %507 = vmatpush.bf16.msra.mxu1 %v813_v29  ;;  %892 = vmatpush.bf16.msra.mxu3 %v813_v29  ;;  %s597_s29 = sadd.s32 %s879_s18, %s848_s27  ;;  %s1150_s1 = scalar_lea.hbm %s1727_s4, 512 }
  0x60   : > { %s850_s7 = sshll.u32 %s597_s29, 2 }
  0x61   : > { %s599_s9 = scalar_lea.hbm %s1727_s4, %s850_s7 }
  0x62   : > { %459 = vmatpush.bf16.msra.mxu0 %v801_v34  ;;  %885 = vmatpush.bf16.msra.mxu2 %v801_v34  ;;  %s602_s20 = sshll.u32 %s599_s9, 4  ;;  %s603_s20 = int_to_ptr.hbm [resolvable:$true] %s602_s20 }
  0x63   : > { %508 = vmatpush.bf16.msra.mxu1 %v805_v35  ;;  %893 = vmatpush.bf16.msra.mxu3 %v805_v35  ;;  %s1144_s22 = sshra.s32 %s603_s20, 4  ;;  %s1145_s22 = int_to_ptr.hbm [resolvable:$true] %s1144_s22 }
  0x64   : > { %s1146_s23 = scalar_lea.hbm %s1145_s22, 128  ;;  %p1151_p6 = scmp.lt.s32.totalorder %s1145_s22, %s1727_s4 }
  0x65   : > { %p1147_p5 = scmp.ne.s32.totalorder %s1145_s22, %s1146_s23  ;;  %p1152_p7 = scmp.lt.s32.totalorder %s1150_s1, %s1146_s23 }
  0x66   : > { %460 = vmatpush.bf16.msra.mxu0 %v793_v40  ;;  %886 = vmatpush.bf16.msra.mxu2 %v793_v40 }
  0x67   : > { %509 = vmatpush.bf16.msra.mxu1 %v797_v41  ;;  %894 = vmatpush.bf16.msra.mxu3 %v797_v41  ;;  %p1148_p8 = pnand %p1147_p5, %p1469_p3  ;;  %p1153_p9 = por %p1152_p7, %p1151_p6 }
  0x69   : > { %p1149_p12 = pneg %p1148_p8 }
  0x6a   : > { %461 = vmatpush.bf16.msra.mxu0 %v785_v46  ;;  %887 = vmatpush.bf16.msra.mxu2 %v785_v46 }
  0x6b   : > { %510 = vmatpush.bf16.msra.mxu1 %v789_v47  ;;  %895 = vmatpush.bf16.msra.mxu3 %v789_v47  ;;  %p1154_p10 = pnand %p1153_p9, %p1149_p12 }
  0x6d   : > { %462 = vmatmul.bf16.vlgmr.msra.gmra.mxu0 %v855_v48  ;;  %482 = vmatmul.bf16.vlgmr.msra.gmra.mxu2 %v859_v49 }
  0x6e   : > { %511 = vmatmul.bf16.vlgmr.msra.gmra.mxu1 %v855_v48  ;;  %531 = vmatmul.bf16.vlgmr.msra.gmra.mxu3 %v859_v49 }
  0x7d   : > { %467 = vmatmul.bf16.gmra.mxu0 %v856_v50  ;;  %487 = vmatmul.bf16.gmra.mxu2 %v860_v51 }
  0x7e   : > { %516 = vmatmul.bf16.gmra.mxu1 %v856_v50  ;;  %536 = vmatmul.bf16.gmra.mxu3 %v860_v51 }
  0x8d   : > { %472 = vmatmul.bf16.gmra.mxu0 %v857_v52  ;;  %492 = vmatmul.bf16.gmra.mxu2 %v861_v53 }
  0x8e   : > { %521 = vmatmul.bf16.gmra.mxu1 %v857_v52  ;;  %541 = vmatmul.bf16.gmra.mxu3 %v861_v53 }
  0x9d   : > { %477 = vmatmul.bf16.gmra.mxu0 %v858_v54  ;;  %497 = vmatmul.bf16.gmra.mxu2 %v862_v55 }
  0x9e   : > { %526 = vmatmul.bf16.gmra.mxu1 %v858_v54  ;;  %546 = vmatmul.bf16.gmra.mxu3 %v862_v55 }
  0xea   : > { %v463_v59 = vpop.f32.mrf.mxu0 }
  0xeb   : > { %v464_v60 = vadd.f32 %v463_v59, %v1556_v57  ;;  %v512_v61 = vpop.f32.mrf.mxu1 }
  0xec   : > { %v513_v62 = vadd.f32 %v512_v61, %v1559_v58 }
  0xee   : > { %v552_v63 = vpack.c.bf16 %v513_v62, %v464_v60 }
  0xf0   : > { %568 = vst [vmem:[%s1565_s30] sm:$0xff] %v552_v63  ;;  %v483_v0 = vpop.f32.mrf.mxu2 }
  0xf1   : > { %v484_v1 = vadd.f32 %v483_v0, %v1556_v57  ;;  %v532_v2 = vpop.f32.mrf.mxu3 }
  0xf2   : > { %v533_v3 = vadd.f32 %v532_v2, %v1559_v58  ;;  %v465_v4 = vpop.f32.mrf.mxu0 }
  0xf3   : > { %v466_v5 = vadd.f32 %v465_v4, %v1556_v57  ;;  %v514_v6 = vpop.f32.mrf.mxu1 }
  0xf4   : > { %v560_v7 = vpack.c.bf16 %v533_v3, %v484_v1  ;;  %v515_v8 = vadd.f32 %v514_v6, %v1559_v58 }
  0xf6   : > { %576 = vst [vmem:[%s1565_s30 + $0x40] sm:$0xff] %v560_v7  ;;  %v553_v9 = vpack.c.bf16 %v515_v8, %v466_v5 }
  0xf8   : > { %569 = vst [vmem:[%s1565_s30 + $0x8] sm:$0xff] %v553_v9  ;;  %v485_v10 = vpop.f32.mrf.mxu2 }
  0xf9   : > { %v486_v11 = vadd.f32 %v485_v10, %v1556_v57  ;;  %v534_v12 = vpop.f32.mrf.mxu3 }
  0xfa   : > { %v535_v13 = vadd.f32 %v534_v12, %v1559_v58  ;;  %v468_v14 = vpop.f32.mrf.mxu0 }
  0xfb   : > { %v469_v15 = vadd.f32 %v468_v14, %v1556_v57  ;;  %v517_v16 = vpop.f32.mrf.mxu1 }
  0xfc   : > { %v561_v17 = vpack.c.bf16 %v535_v13, %v486_v11  ;;  %v518_v18 = vadd.f32 %v517_v16, %v1559_v58 }
  0xfe   : > { %577 = vst [vmem:[%s1565_s30 + $0x48] sm:$0xff] %v561_v17  ;;  %v554_v19 = vpack.c.bf16 %v518_v18, %v469_v15 }
 0x100   : > { %570 = vst [vmem:[%s1565_s30 + $0x10] sm:$0xff] %v554_v19  ;;  %v488_v20 = vpop.f32.mrf.mxu2 }
 0x101   : > { %v489_v21 = vadd.f32 %v488_v20, %v1556_v57  ;;  %v537_v22 = vpop.f32.mrf.mxu3 }
 0x102   : > { %v538_v23 = vadd.f32 %v537_v22, %v1559_v58  ;;  %v470_v24 = vpop.f32.mrf.mxu0 }
 0x103   : > { %v471_v25 = vadd.f32 %v470_v24, %v1556_v57  ;;  %v519_v26 = vpop.f32.mrf.mxu1 }
 0x104   : > { %v562_v27 = vpack.c.bf16 %v538_v23, %v489_v21  ;;  %v520_v28 = vadd.f32 %v519_v26, %v1559_v58 }
 0x106   : > { %578 = vst [vmem:[%s1565_s30 + $0x50] sm:$0xff] %v562_v27  ;;  %v555_v29 = vpack.c.bf16 %v520_v28, %v471_v25 }
 0x108   : > { %571 = vst [vmem:[%s1565_s30 + $0x18] sm:$0xff] %v555_v29  ;;  %v490_v30 = vpop.f32.mrf.mxu2 }
 0x109   : > { %v491_v31 = vadd.f32 %v490_v30, %v1556_v57  ;;  %v539_v32 = vpop.f32.mrf.mxu3 }
 0x10a   : > { %v540_v33 = vadd.f32 %v539_v32, %v1559_v58  ;;  %v473_v34 = vpop.f32.mrf.mxu0 }
 0x10b   : > { %v474_v35 = vadd.f32 %v473_v34, %v1556_v57  ;;  %v522_v36 = vpop.f32.mrf.mxu1 }
 0x10c   : > { %v563_v37 = vpack.c.bf16 %v540_v33, %v491_v31  ;;  %v523_v38 = vadd.f32 %v522_v36, %v1559_v58 }
 0x10e   : > { %579 = vst [vmem:[%s1565_s30 + $0x58] sm:$0xff] %v563_v37  ;;  %v556_v39 = vpack.c.bf16 %v523_v38, %v474_v35 }
 0x110   : > { %572 = vst [vmem:[%s1565_s30 + $0x20] sm:$0xff] %v556_v39  ;;  %v493_v40 = vpop.f32.mrf.mxu2 }
 0x111   : > { %v494_v41 = vadd.f32 %v493_v40, %v1556_v57  ;;  %v542_v42 = vpop.f32.mrf.mxu3 }
 0x112   : > { %v543_v43 = vadd.f32 %v542_v42, %v1559_v58  ;;  %v475_v44 = vpop.f32.mrf.mxu0 }
 0x113   : > { %v476_v45 = vadd.f32 %v475_v44, %v1556_v57  ;;  %v524_v46 = vpop.f32.mrf.mxu1 }
 0x114   : > { %v564_v47 = vpack.c.bf16 %v543_v43, %v494_v41  ;;  %v525_v48 = vadd.f32 %v524_v46, %v1559_v58 }
 0x116   : > { %580 = vst [vmem:[%s1565_s30 + $0x60] sm:$0xff] %v564_v47  ;;  %v557_v49 = vpack.c.bf16 %v525_v48, %v476_v45 }
 0x118   : > { %573 = vst [vmem:[%s1565_s30 + $0x28] sm:$0xff] %v557_v49  ;;  %v495_v50 = vpop.f32.mrf.mxu2 }
 0x119   : > { %v496_v51 = vadd.f32 %v495_v50, %v1556_v57  ;;  %v544_v52 = vpop.f32.mrf.mxu3 }
 0x11a   : > { %v545_v53 = vadd.f32 %v544_v52, %v1559_v58  ;;  %v478_v54 = vpop.f32.mrf.mxu0 }
 0x11b   : > { %v479_v55 = vadd.f32 %v478_v54, %v1556_v57  ;;  %v527_v56 = vpop.f32.mrf.mxu1 }
 0x11c   : > { %v565_v59 = vpack.c.bf16 %v545_v53, %v496_v51  ;;  %v528_v60 = vadd.f32 %v527_v56, %v1559_v58 }
 0x11e   : > { %581 = vst [vmem:[%s1565_s30 + $0x68] sm:$0xff] %v565_v59  ;;  %v558_v61 = vpack.c.bf16 %v528_v60, %v479_v55 }
 0x120   : > { %574 = vst [vmem:[%s1565_s30 + $0x30] sm:$0xff] %v558_v61  ;;  %v498_v62 = vpop.f32.mrf.mxu2 }
 0x121   : > { %v499_v63 = vadd.f32 %v498_v62, %v1556_v57  ;;  %v547_v0 = vpop.f32.mrf.mxu3 }
 0x122   : > { %v548_v1 = vadd.f32 %v547_v0, %v1559_v58  ;;  %v480_v2 = vpop.f32.mrf.mxu0 }
 0x123   : > { %v481_v3 = vadd.f32 %v480_v2, %v1556_v57  ;;  %v529_v4 = vpop.f32.mrf.mxu1 }
 0x124   : > { %v566_v5 = vpack.c.bf16 %v548_v1, %v499_v63  ;;  %v530_v6 = vadd.f32 %v529_v4, %v1559_v58 }
 0x126   : > { %582 = vst [vmem:[%s1565_s30 + $0x70] sm:$0xff] %v566_v5  ;;  %v559_v7 = vpack.c.bf16 %v530_v6, %v481_v3 }
 0x128   : > { %575 = vst [vmem:[%s1565_s30 + $0x38] sm:$0xff] %v559_v7  ;;  %v500_v8 = vpop.f32.mrf.mxu2 }
 0x129   : > { %v501_v9 = vadd.f32 %v500_v8, %v1556_v57  ;;  %v549_v10 = vpop.f32.mrf.mxu3 }
 0x12a   : > { %v550_v11 = vadd.f32 %v549_v10, %v1559_v58 }
 0x12c   : > { %v567_v12 = vpack.c.bf16 %v550_v11, %v501_v9 }
 0x12e   : > { %583 = vst [vmem:[%s1565_s30 + $0x78] sm:$0xff] %v567_v12 }
 0x12f   : > { %1157 = shalt.err (!%p1154_p10)
}
 0x130   : > { %s1287_s5 = smov 128   ;;  %s1288_s30 = smov 256  }
 0x131   : > { %s1289_s15 = smov 8  }
 0x132   : > { %902 = dma.vmem_to_hbm [thread:$0]  (%p1469_p3), %s601_s26, 2048, %s603_s20, %s585_s14, %s1287_s5, %s1288_s30, %s1289_s15  }
 0x133 PF: > { %s1729_s3 = sld [smem:[#allocation12_spill]]  ;;  %p919_p13 = scmp.ge.s32.totalorder %s1280_s25, 2 }
 0x135   : > { %p915_p11 = pnand %p919_p13, %p1473_p2 }
 0x137   : > { %p916_p1 = pneg %p915_p11 }
 0x139   : > { %s617_s18 = sand.u32 1, %s1729_s3  }
 0x13a   : > { %s618_s29 = scalar_lea.sflag [#allocation4], %s617_s18 }
 0x13b   : > { %1223 = dma.done.wait (%p916_p1), %s618_s29, 2048  }
 0x13c   : > { %1225 = vsyncadd (%p916_p1), %s618_s29, 4294965248  ;;  %s22_s25 = sadd.s32 1, %s1280_s25   ;;  %s1732_s21 = sld [smem:[#allocation13_spill]] }
 0x13d   : > { %p1636_p4 = scmp.ge.s32.totalorder %s22_s25, 6   ;;  %s1733_s14 = sld [smem:[#allocation22_spill]] }
 0x13e   : > { %s1734_s8 = sld [smem:[#allocation21_spill]]  ;;  %s1740_s12 = smov %s1232_s13 }
 0x13f   : > { %s1735_s9 = sld [smem:[#allocation14_spill]]  ;;  %s1742_s15 = smov %s1244_s16 }
 0x140   : > { %s1736_s20 = sld [smem:[#allocation20_spill]]  ;;  %s1743_s16 = smov %s1248_s17 }
 0x141   : > { %s1737_s26 = sld [smem:[#allocation17_spill]]  ;;  %s1745_s18 = smov %s1256_s19 }
 0x142   : > { %s1738_s23 = sld [smem:[#allocation18_spill]]  ;;  %s1741_s13 = smov %s1732_s21 }
 0x143   : > { %s1739_s28 = sld [smem:[#allocation19_spill]]  ;;  %s1748_s22 = smov %s1276_s24 }
 0x144   : > { %s1744_s17 = smov %s1734_s8 }
 0x145   : > { %s1746_s19 = smov %s1735_s9  ;;  %21 = sbr.rel (!%p1636_p4) target bundleno = 15 (0xf), region = 101 }
 0x147   : > { %s1747_s21 = smov %s1737_s26 }
 0x149   : > { %s1749_s24 = smov %s1739_s28 }
 0x14a   :  { %624 = vsyncpa [#allocation3], 1 }
 0x14b   :  { %626 = vsyncpa [#allocation3 + $0x1], 1 }
 0x14c   :  { %627 = vsyncpa [#allocation6], 1 }
 0x14d   :  { %629 = vsyncpa [#allocation6 + $0x1], 1 }
 0x14e   :  { %630 = vsyncpa [#allocation4], 1 }
 0x14f   :  { %632 = vsyncpa [#allocation4 + $0x1], 1 }

</bundles_post_ra>
